<compile_context>
chip_gen: v5e
topology: v5e:2x2
jax: 0.10.0
libtpu: 0.0.40
codegen_flags: <defaults>
</compile_context>

<pallas_src>
import jax
import jax.numpy as jnp
from jax.experimental import pallas as pl
from jax.experimental.pallas import tpu as pltpu


def mlp_kernel(x_ref, w1_ref, b1_ref, w2_ref, b2_ref, w3_ref, b3_ref, o_ref):
    x = x_ref[...]                                   # (TB, 2) f32

    # ---- Layer 1: Linear(2, 50) + ReLU, on the VPU (K=2 is MXU-hostile) ----
    w1 = w1_ref[...]                                 # (2, H1) f32
    h1 = (x[:, 0:1] * w1[0:1, :]
          + x[:, 1:2] * w1[1:2, :]
          + b1_ref[...])                             # (TB, H1) f32
    h1 = jnp.maximum(h1, 0.0)

    # ---- Layer 2: Linear(50, 50) + ReLU, MXU bf16 operands, f32 acc ----
    h2 = jnp.dot(h1.astype(jnp.bfloat16), w2_ref[...],
                 preferred_element_type=jnp.float32) + b2_ref[...]
    h2 = jnp.maximum(h2, 0.0)                        # (TB, H2) f32

    # ---- Layer 3: Linear(50, 3), MXU bf16 operands, f32 acc ----
    out = jnp.dot(h2.astype(jnp.bfloat16), w3_ref[...],
                  preferred_element_type=jnp.float32) + b3_ref[...]

    o_ref[...] = out.astype(o_ref.dtype)             # (TB, 3)


def the_prediction_machine(x, params, *, batch_tile=2048):
    """x: (N, 2) float32. params: dict of (W, b) per layer in PyTorch layout
    (W: (out, in), b: (out,)). Returns (N, 3) float32. Handles arbitrary N."""
    N, in_dim = x.shape
    assert in_dim == 2
    assert batch_tile % 8 == 0, "batch_tile must be a multiple of 8 (sublane)"

    # Pre-transpose weights to (in, out); biases to (1, out) for 2-D VMEM tiles.
    # MXU layers (2, 3) get bf16 weights; layer-1 / bias math stays f32.
    w1 = params["w1"].T.astype(jnp.float32)          # (2, 50)
    b1 = params["b1"][None, :].astype(jnp.float32)   # (1, 50)
    w2 = params["w2"].T.astype(jnp.bfloat16)         # (50, 50)
    b2 = params["b2"][None, :].astype(jnp.float32)   # (1, 50)
    w3 = params["w3"].T.astype(jnp.bfloat16)         # (50, 3)
    b3 = params["b3"][None, :].astype(jnp.float32)   # (1, 3)

    H1 = w1.shape[1]
    H2 = w2.shape[1]
    OUT = w3.shape[1]

    # Ragged batch: pad up to a multiple of batch_tile, slice afterwards.
    num_tiles = pl.cdiv(N, batch_tile)
    n_pad = num_tiles * batch_tile
    x_p = x if n_pad == N else jnp.pad(x, ((0, n_pad - N), (0, 0)))

    def full_spec(shape):
        # Full-array block, same block every grid step -> stays VMEM-resident.
        return pl.BlockSpec(shape, lambda i: (0, 0))

    out = pl.pallas_call(
        mlp_kernel,
        out_shape=jax.ShapeDtypeStruct((n_pad, OUT), jnp.float32),
        grid_spec=pltpu.PrefetchScalarGridSpec(
            num_scalar_prefetch=0,
            grid=(num_tiles,),
            in_specs=[
                pl.BlockSpec((batch_tile, in_dim), lambda i: (i, 0)),  # x tile
                full_spec((in_dim, H1)),   # w1
                full_spec((1, H1)),        # b1
                full_spec((H1, H2)),       # w2
                full_spec((1, H2)),        # b2
                full_spec((H2, OUT)),      # w3
                full_spec((1, OUT)),       # b3
            ],
            out_specs=pl.BlockSpec((batch_tile, OUT), lambda i: (i, 0)),
        ),
        compiler_params=pltpu.CompilerParams(
            # Single batch axis, independent tiles -> shard across TCs (v7x).
            dimension_semantics=("parallel",),
            # batch_tile=2048: double-buffered x (2*16 KiB) + out (2*24 KiB)
            # blocks plus ~13 KiB of weights -> well under every scoped VMEM
            # default; no vmem_limit_bytes override needed.
        ),
    )(x_p, w1, b1, w2, b2, w3, b3)
    return out[:N]


def init_params(key):
    """Deterministic synthetic parameters matching nn.Linear shapes
    (W: (out_features, in_features), b: (out_features,))."""
    k1, k2, k3, k4, k5, k6 = jax.random.split(key, 6)
    return {
        "w1": jax.random.normal(k1, (50, 2), dtype=jnp.float32) * 0.5,
        "b1": jax.random.normal(k2, (50,), dtype=jnp.float32) * 0.1,
        "w2": jax.random.normal(k3, (50, 50), dtype=jnp.float32) * 0.1,
        "b2": jax.random.normal(k4, (50,), dtype=jnp.float32) * 0.1,
        "w3": jax.random.normal(k5, (3, 50), dtype=jnp.float32) * 0.1,
        "b3": jax.random.normal(k6, (3,), dtype=jnp.float32) * 0.1,
    }


def reference_forward(x, params):
    """Pure-JAX f32 reference matching the PyTorch forward exactly."""
    h = jnp.maximum(x @ params["w1"].T + params["b1"], 0.0)
    h = jnp.maximum(h @ params["w2"].T + params["b2"], 0.0)
    return h @ params["w3"].T + params["b3"]


if __name__ == "__main__":
    key = jax.random.PRNGKey(0)
    kx, kp = jax.random.split(key)

    # Ragged batch (not a multiple of the tile) + multi-step grid.
    N = 300
    x = jax.random.normal(kx, (N, 2), dtype=jnp.float32)
    params = init_params(kp)

    y = the_prediction_machine(x, params, batch_tile=256)
    y = jax.block_until_ready(y)

    y_ref = reference_forward(x, params)
    assert y.shape == (N, 3)
    # bf16 MXU operands (f32 accumulation) -> loosened tolerance vs pure f32.
    assert jnp.allclose(y, y_ref, atol=5e-2, rtol=5e-2), "mismatch vs reference"

    print("KERNEL_OK")
</pallas_src>

<mosaic_0001>
module attributes {stable_mosaic.version = 11 : i64} {
  func.func @mlp_kernel(%arg0: i32, %arg1: memref<256x2xf32, #tpu.memory_space<vmem>>, %arg2: memref<2x50xf32, #tpu.memory_space<vmem>>, %arg3: memref<1x50xf32, #tpu.memory_space<vmem>>, %arg4: memref<50x50xbf16, #tpu.memory_space<vmem>>, %arg5: memref<1x50xf32, #tpu.memory_space<vmem>>, %arg6: memref<50x3xbf16, #tpu.memory_space<vmem>>, %arg7: memref<1x3xf32, #tpu.memory_space<vmem>>, %arg8: memref<256x3xf32, #tpu.memory_space<vmem>>) attributes {dimension_semantics = [#tpu.dimension_semantics<parallel>], iteration_bounds = array<i64: 2>, scalar_prefetch = 0 : i64, scratch_operands = 0 : i64, tpu.core_type = #tpu.core_type<tc>, window_params = [{transform_indices = @transform_0, window_bounds = array<i64: 256, 2>}, {pipeline_mode = #tpu.pipeline_mode<synchronous>, transform_indices = @transform_1, window_bounds = array<i64: 2, 50>}, {pipeline_mode = #tpu.pipeline_mode<synchronous>, transform_indices = @transform_2, window_bounds = array<i64: 1, 50>}, {pipeline_mode = #tpu.pipeline_mode<synchronous>, transform_indices = @transform_3, window_bounds = array<i64: 50, 50>}, {pipeline_mode = #tpu.pipeline_mode<synchronous>, transform_indices = @transform_4, window_bounds = array<i64: 1, 50>}, {pipeline_mode = #tpu.pipeline_mode<synchronous>, transform_indices = @transform_5, window_bounds = array<i64: 50, 3>}, {pipeline_mode = #tpu.pipeline_mode<synchronous>, transform_indices = @transform_6, window_bounds = array<i64: 1, 3>}, {transform_indices = @transform_7, window_bounds = array<i64: 256, 3>}]} {
    %c0 = arith.constant 0 : index
    %c0_0 = arith.constant 0 : index
    %0 = vector.load %arg1[%c0, %c0_0] : memref<256x2xf32, #tpu.memory_space<vmem>>, vector<256x2xf32>
    %c0_1 = arith.constant 0 : index
    %c0_2 = arith.constant 0 : index
    %1 = vector.load %arg2[%c0_1, %c0_2] : memref<2x50xf32, #tpu.memory_space<vmem>>, vector<2x50xf32>
    %2 = vector.extract_strided_slice %0 {offsets = [0, 0], sizes = [256, 1], strides = [1, 1]} : vector<256x2xf32> to vector<256x1xf32>
    %3 = vector.extract_strided_slice %1 {offsets = [0, 0], sizes = [1, 50], strides = [1, 1]} : vector<2x50xf32> to vector<1x50xf32>
    %4 = vector.broadcast %2 : vector<256x1xf32> to vector<256x50xf32>
    %5 = vector.broadcast %3 : vector<1x50xf32> to vector<256x50xf32>
    %6 = arith.mulf %4, %5 : vector<256x50xf32>
    %7 = vector.extract_strided_slice %0 {offsets = [0, 1], sizes = [256, 1], strides = [1, 1]} : vector<256x2xf32> to vector<256x1xf32>
    %8 = vector.extract_strided_slice %1 {offsets = [1, 0], sizes = [1, 50], strides = [1, 1]} : vector<2x50xf32> to vector<1x50xf32>
    %9 = vector.broadcast %7 : vector<256x1xf32> to vector<256x50xf32>
    %10 = vector.broadcast %8 : vector<1x50xf32> to vector<256x50xf32>
    %11 = arith.mulf %9, %10 : vector<256x50xf32>
    %12 = arith.addf %6, %11 : vector<256x50xf32>
    %c0_3 = arith.constant 0 : index
    %c0_4 = arith.constant 0 : index
    %13 = vector.load %arg3[%c0_3, %c0_4] : memref<1x50xf32, #tpu.memory_space<vmem>>, vector<1x50xf32>
    %14 = vector.broadcast %13 : vector<1x50xf32> to vector<256x50xf32>
    %15 = arith.addf %12, %14 : vector<256x50xf32>
    %cst = arith.constant 0.000000e+00 : f32
    %16 = vector.broadcast %cst : f32 to vector<256x50xf32>
    %17 = arith.maximumf %15, %16 : vector<256x50xf32>
    %18 = arith.truncf %17 : vector<256x50xf32> to vector<256x50xbf16>
    %c0_5 = arith.constant 0 : index
    %c0_6 = arith.constant 0 : index
    %19 = vector.load %arg4[%c0_5, %c0_6] : memref<50x50xbf16, #tpu.memory_space<vmem>>, vector<50x50xbf16>
    %cst_7 = arith.constant dense<0.000000e+00> : vector<256x50xf32>
    %20 = tpu.matmul %18, %19, %cst_7 {dimension_numbers = #tpu.dot_dimension_numbers<[1], [0], [0], [1], [0, 0, 1, 1], [], []>} : vector<256x50xbf16>, vector<50x50xbf16>, vector<256x50xf32> -> vector<256x50xf32>
    %c0_8 = arith.constant 0 : index
    %c0_9 = arith.constant 0 : index
    %21 = vector.load %arg5[%c0_8, %c0_9] : memref<1x50xf32, #tpu.memory_space<vmem>>, vector<1x50xf32>
    %22 = vector.broadcast %21 : vector<1x50xf32> to vector<256x50xf32>
    %23 = arith.addf %20, %22 : vector<256x50xf32>
    %cst_10 = arith.constant 0.000000e+00 : f32
    %24 = vector.broadcast %cst_10 : f32 to vector<256x50xf32>
    %25 = arith.maximumf %23, %24 : vector<256x50xf32>
    %26 = arith.truncf %25 : vector<256x50xf32> to vector<256x50xbf16>
    %c0_11 = arith.constant 0 : index
    %c0_12 = arith.constant 0 : index
    %27 = vector.load %arg6[%c0_11, %c0_12] : memref<50x3xbf16, #tpu.memory_space<vmem>>, vector<50x3xbf16>
    %cst_13 = arith.constant dense<0.000000e+00> : vector<256x3xf32>
    %28 = tpu.matmul %26, %27, %cst_13 {dimension_numbers = #tpu.dot_dimension_numbers<[1], [0], [0], [1], [0, 0, 1, 1], [], []>} : vector<256x50xbf16>, vector<50x3xbf16>, vector<256x3xf32> -> vector<256x3xf32>
    %c0_14 = arith.constant 0 : index
    %c0_15 = arith.constant 0 : index
    %29 = vector.load %arg7[%c0_14, %c0_15] : memref<1x3xf32, #tpu.memory_space<vmem>>, vector<1x3xf32>
    %30 = vector.broadcast %29 : vector<1x3xf32> to vector<256x3xf32>
    %31 = arith.addf %28, %30 : vector<256x3xf32>
    %c0_16 = arith.constant 0 : index
    %c0_17 = arith.constant 0 : index
    %32 = vector.load %arg8[%c0_16, %c0_17] : memref<256x3xf32, #tpu.memory_space<vmem>>, vector<256x3xf32>
    tpu.vector_store %arg8[%c0_16, %c0_17], %31 {strides = array<i32>} : memref<256x3xf32, #tpu.memory_space<vmem>>, vector<256x3xf32>,
    return
  }
  func.func @transform_0(%arg0: i32) -> (i32, i32) {
    %c0_i32 = arith.constant 0 : i32
    %c0_i32_0 = arith.constant 0 : i32
    return %arg0, %c0_i32 : i32, i32
  }
  func.func @transform_1(%arg0: i32) -> (i32, i32) {
    %c0_i32 = arith.constant 0 : i32
    %c0_i32_0 = arith.constant 0 : i32
    %c0_i32_1 = arith.constant 0 : i32
    return %c0_i32, %c0_i32_0 : i32, i32
  }
  func.func @transform_2(%arg0: i32) -> (i32, i32) {
    %c0_i32 = arith.constant 0 : i32
    %c0_i32_0 = arith.constant 0 : i32
    %c0_i32_1 = arith.constant 0 : i32
    return %c0_i32, %c0_i32_0 : i32, i32
  }
  func.func @transform_3(%arg0: i32) -> (i32, i32) {
    %c0_i32 = arith.constant 0 : i32
    %c0_i32_0 = arith.constant 0 : i32
    %c0_i32_1 = arith.constant 0 : i32
    return %c0_i32, %c0_i32_0 : i32, i32
  }
  func.func @transform_4(%arg0: i32) -> (i32, i32) {
    %c0_i32 = arith.constant 0 : i32
    %c0_i32_0 = arith.constant 0 : i32
    %c0_i32_1 = arith.constant 0 : i32
    return %c0_i32, %c0_i32_0 : i32, i32
  }
  func.func @transform_5(%arg0: i32) -> (i32, i32) {
    %c0_i32 = arith.constant 0 : i32
    %c0_i32_0 = arith.constant 0 : i32
    %c0_i32_1 = arith.constant 0 : i32
    return %c0_i32, %c0_i32_0 : i32, i32
  }
  func.func @transform_6(%arg0: i32) -> (i32, i32) {
    %c0_i32 = arith.constant 0 : i32
    %c0_i32_0 = arith.constant 0 : i32
    %c0_i32_1 = arith.constant 0 : i32
    return %c0_i32, %c0_i32_0 : i32, i32
  }
  func.func @transform_7(%arg0: i32) -> (i32, i32) {
    %c0_i32 = arith.constant 0 : i32
    %c0_i32_0 = arith.constant 0 : i32
    return %arg0, %c0_i32 : i32, i32
  }
}

</mosaic_0001>

<bundles_post_ra>
// kernel: tpu_custom_call.1
= control target key start
LH: loop header
LB: loop body
LE: loop exit
PB: predicated region body
PF: predicated region fallthrough
CT: control target
= control target key end

     0   :  { %s1447_s24 = smov 0   ;;  %s1876_s0 = inlined_call_operand.vmem [shape: f32[512,2], index: 0, kind: input, shape index: {}]   ;;  %s1877_s1 = inlined_call_operand.vmem [shape: f32[2,50], index: 1, kind: input, shape index: {}]   ;;  %s1878_s2 = inlined_call_operand.vmem [shape: f32[1,50], index: 2, kind: input, shape index: {}]   ;;  %s1879_s3 = inlined_call_operand.vmem [shape: bf16[50,50], index: 3, kind: input, shape index: {}]   ;;  %s1880_s4 = inlined_call_operand.vmem [shape: f32[1,50], index: 4, kind: input, shape index: {}]   ;;  %s1881_s5 = inlined_call_operand.vmem [shape: bf16[50,3], index: 5, kind: input, shape index: {}]   ;;  %s1882_s6 = inlined_call_operand.vmem [shape: f32[1,3], index: 6, kind: input, shape index: {}]   ;;  %s1883_s7 = inlined_call_operand.vmem [shape: f32[512,3], index: 7, kind: output, shape index: {}]  }
   0x1 LB: > { %s1269_s25 = sadd.s32 4294967295, %s1403_s24   ;;  %p1273_p0 = scmp.ge.s32.totalorder %s1403_s24, 1  ;;  %s1403_s24 = sphi %s1447_s24, %s17_s24  }
   0x2   : > { %p238_p1 = scmp.lt.s32.totalorder %s1403_s24, 3 }
   0x4   : > { %p239_p2 = pnand %p1273_p0, %p238_p1 }
   0x5   : > { %s1274_s26 = sshll.u32 (!%p239_p2), %s1269_s25, 5 }
   0x6   : > { %242 = sbr.rel (%p239_p2) target bundleno = 615 (0x267), region = 48  ;;  %p271_p3 = scmp.lt.s32.totalorder (!%p239_p2), %s1274_s26, 63 }
   0xb   : > { %v1405_v0 = vmov 1   ;;  %v1406_v1 = vmov 0   ;;  %s1885_s26 = smov (!%p271_p3, %s1274_s26), 63  ;;  %v792_v19 = vld [vmem:[%s1879_s3 + $0x18] sm:$0x1]  ;;  %vm867_vm0 = vcmask 1040384  }
   0xc   : > { %1361 = vset.pattern.permute.xlu1 %v1405_v0  ;;  %1362 = vset.pattern.permute.xlu2 %v1406_v1  ;;  %s1275_s27 = sshll.u32 %s1885_s26, 3  ;;  %v810_v20 = vunpack.c.l.b16 %v792_v19  ;;  %v1338_v25 = vld [vmem:[%s1879_s3 + $0x10] sm:$0xff]  ;;  %v1337_v28 = vld [vmem:[%s1879_s3 + $0x8] sm:$0xff]  ;;  %v1336_v30 = vld [vmem:[%s1879_s3] sm:$0xff]  ;;  %vm818_vm1 = vcmask 408576   ;;  %vm1180_vm2 = vcmask 23552  }
   0xd   : > { %1360 = vset.pattern.permute.xlu0 %v1406_v1  ;;  %s1466_s30 = scalar_lea.vmem %s1876_s0, %s1275_s27  ;;  %v315_v33 = vld [vmem:[%s1877_s1] sm:$0x3]  ;;  %s1762_s14 = scalar_lea.vmem %s1883_s7, %s1275_s27 }
   0xe   : > { %v299_v2 = vld [vmem:[%s1466_s30 + $0x80] sm:$0xff]  ;;  %v300_v4 = vld [vmem:[%s1466_s30 + $0x88] sm:$0xff]  ;;  %v301_v7 = vld [vmem:[%s1466_s30 + $0x90] sm:$0xff]  ;;  %v814_v22 = vpack.c.b16 %v810_v20, %v810_v20  ;;  %v1531_v35 = vperm.slane %v315_v33, 0  ;;  %v1533_v36 = vperm.slane %v315_v33, 1 }
   0xf   : > { %v283_v3 = vld [vmem:[%s1466_s30] sm:$0xff]  ;;  %574 = vperm.xlu1 %1361, %v299_v2   ;;  %398 = vperm.xlu0 %1360, %v299_v2   ;;  %v284_v5 = vld [vmem:[%s1466_s30 + $0x8] sm:$0xff]  ;;  %v302_v9 = vld [vmem:[%s1466_s30 + $0x98] sm:$0xff] }
  0x10   : > { %318 = vperm.xlu2 %1362, %v283_v3   ;;  %v304_v6 = vld [vmem:[%s1466_s30 + $0xa8] sm:$0xff]  ;;  %v285_v10 = vld [vmem:[%s1466_s30 + $0x10] sm:$0xff]  ;;  %v286_v11 = vld [vmem:[%s1466_s30 + $0x18] sm:$0xff]  ;;  %v869_v24 = vsel %vm867_vm0, %v814_v22, 0 }
  0x11   : > { %v1475_v8 = vld [vmem:[%s1466_s30 + $0xc8] sm:$0xff]  ;;  %v303_v12 = vld [vmem:[%s1466_s30 + $0xa0] sm:$0xff]  ;;  %v306_v15 = vld [vmem:[%s1466_s30 + $0xb8] sm:$0xff]  ;;  %1342 = vmatpush.bf16.msra.mxu2 %v869_v24  ;;  %875 = vmatpush.bf16.msra.mxu0 %v869_v24 }
  0x12   : > { %v287_v13 = vld [vmem:[%s1466_s30 + $0x20] sm:$0xff]  ;;  %v288_v14 = vld [vmem:[%s1466_s30 + $0x28] sm:$0xff]  ;;  %v305_v16 = vld [vmem:[%s1466_s30 + $0xb0] sm:$0xff] }
  0x13   : > { %v289_v17 = vld [vmem:[%s1466_s30 + $0x30] sm:$0xff]  ;;  %v291_v18 = vld [vmem:[%s1466_s30 + $0x40] sm:$0xff]  ;;  %v290_v21 = vld [vmem:[%s1466_s30 + $0x38] sm:$0xff] }
  0x14   : > { %v310_v23 = vld [vmem:[%s1466_s30 + $0xd8] sm:$0xff]  ;;  %v307_v27 = vld [vmem:[%s1466_s30 + $0xc0] sm:$0xff]  ;;  %v293_v29 = vld [vmem:[%s1466_s30 + $0x50] sm:$0xff] }
  0x15   : > { %1343 = vmatpush.bf16.msra.mxu2 %v1338_v25  ;;  %876 = vmatpush.bf16.msra.mxu0 %v1338_v25  ;;  %v292_v34 = vld [vmem:[%s1466_s30 + $0x48] sm:$0xff]  ;;  %v309_v42 = vld [vmem:[%s1466_s30 + $0xd0] sm:$0xff]  ;;  %v1542_v43 = vld [vmem:[%s1878_s2] ss:$0 sm:$0xff] }
  0x16   : > { %v1545_v45 = vld [vmem:[%s1466_s30 + $0xe8] sm:$0xff]  ;;  %v295_v58 = vld [vmem:[%s1466_s30 + $0x60] sm:$0xff]  ;;  %v294_v62 = vld [vmem:[%s1466_s30 + $0x58] sm:$0xff] }
  0x17   : > { %578 = vperm.xlu1 %1361, %v300_v4   ;;  %403 = vperm.xlu0 %1360, %v300_v4   ;;  %v1564_v63 = vld [vmem:[%s1466_s30 + $0xf8] sm:$0xff] }
  0x18   : > { %323 = vperm.xlu2 %1362, %v284_v5  }
  0x19   : > { %1344 = vmatpush.bf16.msra.mxu2 %v1337_v28  ;;  %877 = vmatpush.bf16.msra.mxu0 %v1337_v28 }
  0x1d   : > { %1345 = vmatpush.bf16.msra.mxu2 %v1336_v30  ;;  %878 = vmatpush.bf16.msra.mxu0 %v1336_v30 }
  0x1f   : > { %423 = vperm.xlu0 %1360, %v304_v6   ;;  %514 = vperm.xlu1 %1361, %v284_v5  }
  0x20   : > { %408 = vperm.xlu2 %1362, %v301_v7  }
  0x27   : > { %443 = vperm.xlu0 %1360, %v1475_v8   ;;  %1363 = vset.pattern.permute.xlu1 %v1406_v1 }
  0x28   : > { %1364 = vset.pattern.permute.xlu2 %v1405_v0  ;;  %413 = vperm.xlu1 %1363, %v302_v9  }
  0x29   : > { %582 = vperm.xlu2 %1364, %v301_v7   ;;  %v311_v7 = vld [vmem:[%s1466_s30 + $0xe0] sm:$0xff] }
  0x2f   : > { %1375 = vset.pattern.permute.xlu0 %v1405_v0 }
  0x30   : > { %328 = vperm.xlu1 %1363, %v285_v10   ;;  %510 = vperm.xlu0 %1375, %v283_v3  }
  0x31   : > { %1365 = vset.pattern.permute.xlu2 %v1406_v1 }
  0x32   : > { %333 = vperm.xlu2 %1365, %v286_v11  }
  0x38   : > { %1366 = vset.pattern.permute.xlu1 %v1405_v0  ;;  %586 = vperm.xlu0 %1375, %v302_v9  }
  0x39   : > { %522 = vperm.xlu1 %1366, %v286_v11  }
  0x3a   : > { %418 = vperm.xlu2 %1365, %v303_v12  }
  0x40   : > { %518 = vperm.xlu0 %1375, %v285_v10  }
  0x41   : > { %590 = vperm.xlu1 %1366, %v303_v12  }
  0x42   : > { %1367 = vset.pattern.permute.xlu2 %v1405_v0 }
  0x43   : > { %594 = vperm.xlu2 %1367, %v304_v6  }
  0x48   : > { %526 = vperm.xlu0 %1375, %v287_v13  }
  0x49   : > { %1368 = vset.pattern.permute.xlu1 %v1406_v1 }
  0x4a   : > { %338 = vperm.xlu1 %1368, %v287_v13  }
  0x4b   : > { %1369 = vset.pattern.permute.xlu2 %v1406_v1 }
  0x4c   : > { %343 = vperm.xlu2 %1369, %v288_v14  }
  0x50   : > { %602 = vperm.xlu0 %1375, %v306_v15  }
  0x52   : > { %1370 = vset.pattern.permute.xlu1 %v1405_v0 }
  0x53   : > { %530 = vperm.xlu1 %1370, %v288_v14  }
  0x54   : > { %428 = vperm.xlu2 %1369, %v305_v16  }
  0x58   : > { %534 = vperm.xlu0 %1375, %v289_v17  }
  0x5b   : > { %1371 = vset.pattern.permute.xlu1 %v1406_v1 }
  0x5c   : > { %1372 = vset.pattern.permute.xlu2 %v1405_v0  ;;  %433 = vperm.xlu1 %1371, %v306_v15  }
  0x5d   : > { %598 = vperm.xlu2 %1372, %v305_v16  }
  0x60   : > { %542 = vperm.xlu0 %1375, %v291_v18  }
  0x64   : > { %348 = vperm.xlu1 %1371, %v289_v17  }
  0x65   : > { %1373 = vset.pattern.permute.xlu2 %v1406_v1 }
  0x66   : > { %353 = vperm.xlu2 %1373, %v290_v21  }
  0x68   : > { %618 = vperm.xlu0 %1375, %v310_v23  }
  0x6a   : > { %v1509_v26 = vpop.permute.xlu2 %318 }
  0x6b   : > { %v477_v11 = vmul.f32 %v1531_v35, %v1509_v26 }
  0x6c   : > { %1374 = vset.pattern.permute.xlu1 %v1405_v0 }
  0x6d   : > { %538 = vperm.xlu1 %1374, %v290_v21  }
  0x6e   : > { %438 = vperm.xlu2 %1373, %v307_v27  }
  0x70   : > { %550 = vperm.xlu0 %1375, %v293_v29  }
  0x72   : > { %v324_v31 = vpop.permute.xlu2 %323 }
  0x73   : > { %v478_v5 = vmul.f32 %v1531_v35, %v324_v31 }
  0x75   : > { %606 = vperm.xlu1 %1374, %v307_v27  }
  0x76   : > { %1376 = vset.pattern.permute.xlu2 %v1405_v0 }
  0x77   : > { %610 = vperm.xlu2 %1376, %v1475_v8   ;;  %v1572_v8 = vld [vmem:[%s1466_s30 + $0x70] sm:$0xff] }
  0x78   : > { %1384 = vset.pattern.permute.xlu0 %v1406_v1 }
  0x79   : > { %463 = vperm.xlu0 %1384, %v1545_v45  }
  0x7a   : > { %v1523_v32 = vpop.permute.xlu2 %408 }
  0x7b   : > { %v495_v13 = vmul.f32 %v1531_v35, %v1523_v32 }
  0x7d   : > { %1377 = vset.pattern.permute.xlu1 %v1406_v1 }
  0x7e   : > { %358 = vperm.xlu1 %1377, %v291_v18  }
  0x7f   : > { %1378 = vset.pattern.permute.xlu2 %v1406_v1 }
  0x80   : > { %363 = vperm.xlu2 %1378, %v292_v34  }
  0x81   : > { %v575_v37 = vpop.permute.xlu1 %574  ;;  %v399_v38 = vpop.permute.xlu0 %398  ;;  %1388 = vset.pattern.permute.xlu0 %v1405_v0 }
  0x82   : > { %v654_v39 = vmul.f32 %v1533_v36, %v575_v37  ;;  %v493_v40 = vmul.f32 %v1531_v35, %v399_v38  ;;  %558 = vperm.xlu0 %1388, %v295_v58  }
  0x83   : > { %v583_v41 = vpop.permute.xlu2 %582 }
  0x84   : > { %v686_v44 = vadd.f32 %v654_v39, %v493_v40  ;;  %v656_v14 = vmul.f32 %v1533_v36, %v583_v41 }
  0x86   : > { %1379 = vset.pattern.permute.xlu1 %v1405_v0  ;;  %v722_v50 = vadd.f32 %v1542_v43, %v686_v44  ;;  %v688_v19 = vadd.f32 %v656_v14, %v495_v13 }
  0x87   : > { %546 = vperm.xlu1 %1379, %v292_v34  }
  0x88   : > { %448 = vperm.xlu2 %1378, %v309_v42   ;;  %v754_v54 = vmax.f32 %v722_v50, 0.0  ;;  %v724_v27 = vadd.f32 %v1542_v43, %v688_v19 }
  0x89   : > { %v579_v46 = vpop.permute.xlu1 %578  ;;  %v404_v47 = vpop.permute.xlu0 %403 }
  0x8a   : > { %v655_v48 = vmul.f32 %v1533_v36, %v579_v46  ;;  %v494_v49 = vmul.f32 %v1531_v35, %v404_v47  ;;  %634 = vperm.xlu0 %1388, %v1564_v63   ;;  %v756_v33 = vmax.f32 %v724_v27, 0.0  ;;  %v296_v46 = vld [vmem:[%s1466_s30 + $0x68] sm:$0xff] }
  0x8c   : > { %v687_v51 = vadd.f32 %v655_v48, %v494_v49  ;;  %v334_v52 = vpop.permute.xlu2 %333 }
  0x8d   : > { %v480_v30 = vmul.f32 %v1531_v35, %v334_v52 }
  0x8e   : > { %v723_v53 = vadd.f32 %v1542_v43, %v687_v51 }
  0x8f   : > { %1380 = vset.pattern.permute.xlu1 %v1406_v1 }
  0x90   : > { %v755_v55 = vmax.f32 %v723_v53, 0.0  ;;  %453 = vperm.xlu1 %1380, %v310_v23   ;;  %1381 = vset.pattern.permute.xlu2 %v1405_v0 }
  0x91   : > { %v515_v56 = vpop.permute.xlu1 %514  ;;  %v424_v57 = vpop.permute.xlu0 %423  ;;  %614 = vperm.xlu2 %1381, %v309_v42  }
  0x92   : > { %v778_v59 = vpack.c.bf16 %v755_v55, %v754_v54  ;;  %v639_v3 = vmul.f32 %v1533_v36, %v515_v56  ;;  %566 = vperm.xlu0 %1388, %v1572_v8   ;;  %v498_v38 = vmul.f32 %v1531_v35, %v424_v57  ;;  %v313_v56 = vld [vmem:[%s1466_s30 + $0xf0] sm:$0xff] }
  0x94   : > { %1298 = vmatmul.msk.bf16.vlgmr.msra.gmra.mxu2 %vm818_vm1, %v778_v59  ;;  %v1557_v60 = vpop.permute.xlu2 %418  ;;  %v671_v6 = vadd.f32 %v639_v3, %v478_v5 }
  0x95   : > { %v497_v48 = vmul.f32 %v1531_v35, %v1557_v60 }
  0x96   : > { %v707_v15 = vadd.f32 %v1542_v43, %v671_v6 }
  0x98   : > { %368 = vperm.xlu1 %1380, %v293_v29   ;;  %v739_v20 = vmax.f32 %v707_v15, 0.0 }
  0x99   : > { %v1559_v61 = vpop.permute.xlu0 %443  ;;  %1382 = vset.pattern.permute.xlu2 %v1406_v1 }
  0x9a   : > { %v414_v2 = vpop.permute.xlu1 %413  ;;  %373 = vperm.xlu2 %1382, %v294_v62  }
  0x9b   : > { %v496_v23 = vmul.f32 %v1531_v35, %v414_v2 }
  0x9d   : > { %v595_v4 = vpop.permute.xlu2 %594 }
  0x9e   : > { %v659_v40 = vmul.f32 %v1533_v36, %v595_v4 }
  0xa0   : > { %1383 = vset.pattern.permute.xlu1 %v1405_v0  ;;  %v691_v51 = vadd.f32 %v659_v40, %v498_v38 }
  0xa1   : > { %554 = vperm.xlu1 %1383, %v294_v62  }
  0xa2   : > { %v329_v9 = vpop.permute.xlu1 %328  ;;  %v511_v10 = vpop.permute.xlu0 %510  ;;  %458 = vperm.xlu2 %1382, %v311_v7  }
  0xa3   : > { %v638_v12 = vmul.f32 %v1533_v36, %v511_v10  ;;  %v479_v41 = vmul.f32 %v1531_v35, %v329_v9 }
  0xa5   : > { %v670_v16 = vadd.f32 %v638_v12, %v477_v11 }
  0xa6   : > { %v1582_v17 = vpop.permute.xlu2 %343 }
  0xa7   : > { %v706_v18 = vadd.f32 %v1542_v43, %v670_v16  ;;  %v482_v12 = vmul.f32 %v1531_v35, %v1582_v17  ;;  %v298_v17 = vld [vmem:[%s1466_s30 + $0x78] sm:$0xff] }
  0xa9   : > { %v738_v21 = vmax.f32 %v706_v18, 0.0  ;;  %622 = vperm.xlu1 %1383, %v311_v7  }
  0xaa   : > { %v587_v22 = vpop.permute.xlu0 %586  ;;  %1385 = vset.pattern.permute.xlu2 %v1405_v0 }
  0xab   : > { %v657_v24 = vmul.f32 %v1533_v36, %v587_v22  ;;  %v523_v25 = vpop.permute.xlu1 %522  ;;  %v770_v26 = vpack.c.bf16 %v739_v20, %v738_v21  ;;  %626 = vperm.xlu2 %1385, %v1545_v45  }
  0xac   : > { %v641_v29 = vmul.f32 %v1533_v36, %v523_v25 }
  0xad   : > { %v689_v28 = vadd.f32 %v657_v24, %v496_v23  ;;  %1290 = vmatmul.msk.bf16.vlgmr.msra.gmra.mxu0 %vm818_vm1, %v770_v26 }
  0xae   : > { %v429_v32 = vpop.permute.xlu2 %428  ;;  %v673_v37 = vadd.f32 %v641_v29, %v480_v30 }
  0xaf   : > { %v725_v31 = vadd.f32 %v1542_v43, %v689_v28  ;;  %v499_v16 = vmul.f32 %v1531_v35, %v429_v32 }
  0xb0   : > { %v709_v49 = vadd.f32 %v1542_v43, %v673_v37 }
  0xb1   : > { %v757_v34 = vmax.f32 %v725_v31, 0.0  ;;  %1386 = vset.pattern.permute.xlu1 %v1406_v1 }
  0xb2   : > { %378 = vperm.xlu1 %1386, %v295_v58   ;;  %v519_v39 = vpop.permute.xlu0 %518  ;;  %v741_v54 = vmax.f32 %v709_v49, 0.0  ;;  %v727_v58 = vadd.f32 %v1542_v43, %v691_v51 }
  0xb3   : > { %v640_v42 = vmul.f32 %v1533_v36, %v519_v39  ;;  %v591_v44 = vpop.permute.xlu1 %590  ;;  %v779_v45 = vpack.c.bf16 %v757_v34, %v756_v33  ;;  %1387 = vset.pattern.permute.xlu2 %v1406_v1 }
  0xb4   : > { %v658_v47 = vmul.f32 %v1533_v36, %v591_v44  ;;  %383 = vperm.xlu2 %1387, %v296_v46   ;;  %v759_v2 = vmax.f32 %v727_v58, 0.0 }
  0xb5   : > { %v672_v50 = vadd.f32 %v640_v42, %v479_v41  ;;  %1299 = vmatmul.msk.bf16.gmra.mxu2 %vm818_vm1, %v779_v45 }
  0xb6   : > { %v690_v53 = vadd.f32 %v658_v47, %v497_v48  ;;  %v502_v47 = vmul.f32 %v1531_v35, %v1559_v61 }
  0xb7   : > { %v708_v52 = vadd.f32 %v1542_v43, %v672_v50  ;;  %v599_v57 = vpop.permute.xlu2 %598 }
  0xb8   : > { %v726_v59 = vadd.f32 %v1542_v43, %v690_v53  ;;  %v660_v18 = vmul.f32 %v1533_v36, %v599_v57 }
  0xb9   : > { %v740_v55 = vmax.f32 %v708_v52, 0.0 }
  0xba   : > { %1389 = vset.pattern.permute.xlu1 %v1405_v0  ;;  %v758_v3 = vmax.f32 %v726_v59, 0.0  ;;  %v527_v4 = vpop.permute.xlu0 %526  ;;  %v692_v22 = vadd.f32 %v660_v18, %v499_v16  ;;  %v1341_v16 = vld [vmem:[%s1881_s5 + $0x10] sm:$0xff] }
  0xbb   : > { %562 = vperm.xlu1 %1389, %v296_v46   ;;  %v771_v60 = vpack.c.bf16 %v741_v54, %v740_v55  ;;  %v642_v5 = vmul.f32 %v1533_v36, %v527_v4 }
  0xbc   : > { %v339_v62 = vpop.permute.xlu1 %338  ;;  %468 = vperm.xlu2 %1387, %v313_v56   ;;  %v780_v7 = vpack.c.bf16 %v759_v2, %v758_v3  ;;  %v728_v28 = vadd.f32 %v1542_v43, %v692_v22  ;;  %v1014_v3 = vld [vmem:[%s1881_s5 + $0x18] sm:$0x1] }
  0xbd   : > { %1291 = vmatmul.msk.bf16.gmra.mxu0 %vm818_vm1, %v771_v60  ;;  %v481_v6 = vmul.f32 %v1531_v35, %v339_v62 }
  0xbf   : > { %v674_v9 = vadd.f32 %v642_v5, %v481_v6  ;;  %v1032_v5 = vunpack.c.l.b16 %v1014_v3 }
  0xc0   : > { %v354_v10 = vpop.permute.xlu2 %353 }
  0xc1   : > { %v710_v14 = vadd.f32 %v1542_v43, %v674_v9  ;;  %v484_v41 = vmul.f32 %v1531_v35, %v354_v10  ;;  %v1036_v9 = vpack.c.b16 %v1032_v5, %v1032_v5 }
  0xc2   : > { %v603_v20 = vpop.permute.xlu0 %602 }
  0xc3   : > { %1390 = vset.pattern.permute.xlu1 %v1406_v1  ;;  %v742_v19 = vmax.f32 %v710_v14, 0.0  ;;  %v661_v23 = vmul.f32 %v1533_v36, %v603_v20 }
  0xc4   : > { %473 = vperm.xlu1 %1390, %v1564_v63   ;;  %1391 = vset.pattern.permute.xlu2 %v1405_v0 }
  0xc5   : > { %v531_v11 = vpop.permute.xlu1 %530  ;;  %1300 = vmatmul.msk.bf16.gmra.mxu2 %vm818_vm1, %v780_v7  ;;  %630 = vperm.xlu2 %1391, %v313_v56  }
  0xc6   : > { %v643_v13 = vmul.f32 %v1533_v36, %v531_v11  ;;  %v1089_v11 = vsel %vm867_vm0, %v1036_v9, 0 }
  0xc7   : > { %1346 = vmatpush.bf16.msra.mxu3 %v1089_v11  ;;  %1095 = vmatpush.bf16.msra.mxu1 %v1089_v11 }
  0xc8   : > { %v675_v15 = vadd.f32 %v643_v13, %v482_v12  ;;  %v439_v24 = vpop.permute.xlu2 %438 }
  0xc9   : > { %v501_v53 = vmul.f32 %v1531_v35, %v439_v24 }
  0xca   : > { %v711_v63 = vadd.f32 %v1542_v43, %v675_v15  ;;  %v535_v37 = vpop.permute.xlu0 %534 }
  0xcb   : > { %v644_v38 = vmul.f32 %v1533_v36, %v535_v37  ;;  %1347 = vmatpush.bf16.msra.mxu3 %v1341_v16  ;;  %1096 = vmatpush.bf16.msra.mxu1 %v1341_v16 }
  0xcc   : > { %v743_v21 = vmax.f32 %v711_v63, 0.0  ;;  %388 = vperm.xlu1 %1390, %v1572_v8   ;;  %v760_v8 = vmax.f32 %v728_v28, 0.0 }
  0xcd   : > { %1392 = vset.pattern.permute.xlu2 %v1406_v1 }
  0xce   : > { %v434_v25 = vpop.permute.xlu1 %433  ;;  %v772_v26 = vpack.c.bf16 %v743_v21, %v742_v19  ;;  %393 = vperm.xlu2 %1392, %v298_v17  }
  0xcf   : > { %v500_v27 = vmul.f32 %v1531_v35, %v434_v25 }
  0xd0   : > { %1292 = vmatmul.msk.bf16.gmra.mxu0 %vm818_vm1, %v772_v26 }
  0xd1   : > { %v693_v29 = vadd.f32 %v661_v23, %v500_v27  ;;  %v611_v33 = vpop.permute.xlu2 %610  ;;  %v1340_v23 = vld [vmem:[%s1881_s5 + $0x8] sm:$0xff] }
  0xd2   : > { %v663_v44 = vmul.f32 %v1533_v36, %v611_v33  ;;  %v543_v4 = vpop.permute.xlu0 %542  ;;  %1348 = vmatpush.bf16.msra.mxu3 %v1340_v23  ;;  %1097 = vmatpush.bf16.msra.mxu1 %v1340_v23 }
  0xd3   : > { %v729_v30 = vadd.f32 %v1542_v43, %v693_v29  ;;  %v646_v10 = vmul.f32 %v1533_v36, %v543_v4  ;;  %v1339_v29 = vld [vmem:[%s1881_s5] sm:$0xff] }
  0xd4   : > { %1393 = vset.pattern.permute.xlu1 %v1405_v0  ;;  %v695_v49 = vadd.f32 %v663_v44, %v502_v47 }
  0xd5   : > { %v761_v31 = vmax.f32 %v729_v30, 0.0  ;;  %570 = vperm.xlu1 %1393, %v298_v17  }
  0xd6   : > { %v349_v32 = vpop.permute.xlu1 %348  ;;  %v731_v56 = vadd.f32 %v1542_v43, %v695_v49  ;;  %1349 = vmatpush.bf16.msra.mxu3 %v1339_v29  ;;  %1098 = vmatpush.bf16.msra.mxu1 %v1339_v29 }
  0xd7   : > { %v781_v1 = vpack.c.bf16 %v761_v31, %v760_v8  ;;  %v483_v34 = vmul.f32 %v1531_v35, %v349_v32 }
  0xd8   : > { %v763_v61 = vmax.f32 %v731_v56, 0.0 }
  0xd9   : > { %1301 = vmatmul.msk.bf16.gmra.mxu2 %vm818_vm1, %v781_v1  ;;  %v676_v39 = vadd.f32 %v644_v38, %v483_v34 }
  0xda   : > { %v364_v0 = vpop.permute.xlu2 %363  ;;  %v619_v17 = vpop.permute.xlu0 %618 }
  0xdb   : > { %v712_v45 = vadd.f32 %v1542_v43, %v676_v39  ;;  %v486_v14 = vmul.f32 %v1531_v35, %v364_v0  ;;  %v665_v30 = vmul.f32 %v1533_v36, %v619_v17 }
  0xdd   : > { %v744_v50 = vmax.f32 %v712_v45, 0.0 }
  0xdf   : > { %v539_v40 = vpop.permute.xlu1 %538 }
  0xe0   : > { %v645_v42 = vmul.f32 %v1533_v36, %v539_v40 }
  0xe2   : > { %v677_v46 = vadd.f32 %v645_v42, %v484_v41  ;;  %v449_v58 = vpop.permute.xlu2 %448  ;;  %v551_v34 = vpop.permute.xlu0 %550 }
  0xe3   : > { %v503_v20 = vmul.f32 %v1531_v35, %v449_v58  ;;  %v648_v42 = vmul.f32 %v1533_v36, %v551_v34  ;;  %v1688_v58 = vld [vmem:[%s1880_s4] ss:$0 sm:$0xff] }
  0xe4   : > { %v713_v48 = vadd.f32 %v1542_v43, %v677_v46 }
  0xe6   : > { %v745_v51 = vmax.f32 %v713_v48, 0.0 }
  0xe7   : > { %v607_v52 = vpop.permute.xlu1 %606 }
  0xe8   : > { %v662_v54 = vmul.f32 %v1533_v36, %v607_v52  ;;  %v773_v55 = vpack.c.bf16 %v745_v51, %v744_v50 }
  0xea   : > { %v694_v57 = vadd.f32 %v662_v54, %v501_v53  ;;  %1293 = vmatmul.msk.bf16.gmra.mxu0 %vm818_vm1, %v773_v55 }
  0xeb   : > { %v615_v7 = vpop.permute.xlu2 %614  ;;  %v464_v44 = vpop.permute.xlu0 %463 }
  0xec   : > { %v730_v59 = vadd.f32 %v1542_v43, %v694_v57  ;;  %v664_v21 = vmul.f32 %v1533_v36, %v615_v7  ;;  %v506_v50 = vmul.f32 %v1531_v35, %v464_v44 }
  0xee   : > { %v762_v60 = vmax.f32 %v730_v59, 0.0  ;;  %v696_v26 = vadd.f32 %v664_v21, %v503_v20 }
  0xf0   : > { %v359_v62 = vpop.permute.xlu1 %358  ;;  %v782_v2 = vpack.c.bf16 %v763_v61, %v762_v60  ;;  %v732_v31 = vadd.f32 %v1542_v43, %v696_v26 }
  0xf1   : > { %v485_v6 = vmul.f32 %v1531_v35, %v359_v62 }
  0xf2   : > { %1302 = vmatmul.msk.bf16.gmra.mxu2 %vm818_vm1, %v782_v2  ;;  %v764_v37 = vmax.f32 %v732_v31, 0.0 }
  0xf3   : > { %v678_v12 = vadd.f32 %v646_v10, %v485_v6 }
  0xf4   : > { %v374_v19 = vpop.permute.xlu2 %373 }
  0xf5   : > { %v714_v18 = vadd.f32 %v1542_v43, %v678_v12  ;;  %v488_v47 = vmul.f32 %v1531_v35, %v374_v19 }
  0xf7   : > { %v746_v24 = vmax.f32 %v714_v18, 0.0 }
  0xf9   : > { %v547_v13 = vpop.permute.xlu1 %546 }
  0xfa   : > { %v647_v15 = vmul.f32 %v1533_v36, %v547_v13 }
  0xfc   : > { %v679_v63 = vadd.f32 %v647_v15, %v486_v14  ;;  %v459_v1 = vpop.permute.xlu2 %458 }
  0xfd   : > { %v505_v60 = vmul.f32 %v1531_v35, %v459_v1 }
  0xfe   : > { %v715_v22 = vadd.f32 %v1542_v43, %v679_v63  ;;  %v559_v63 = vpop.permute.xlu0 %558 }
  0xff   : > { %v650_v19 = vmul.f32 %v1533_v36, %v559_v63 }
 0x100   : > { %v747_v25 = vmax.f32 %v715_v22, 0.0 }
 0x102   : > { %v454_v27 = vpop.permute.xlu1 %453  ;;  %v774_v28 = vpack.c.bf16 %v747_v25, %v746_v24 }
 0x103   : > { %v504_v8 = vmul.f32 %v1531_v35, %v454_v27 }
 0x104   : > { %1294 = vmatmul.msk.bf16.gmra.mxu0 %vm818_vm1, %v774_v28 }
 0x105   : > { %v697_v32 = vadd.f32 %v665_v30, %v504_v8  ;;  %v627_v0 = vpop.permute.xlu2 %626 }
 0x106   : > { %v667_v48 = vmul.f32 %v1533_v36, %v627_v0 }
 0x107   : > { %v733_v33 = vadd.f32 %v1542_v43, %v697_v32 }
 0x108   : > { %v699_v55 = vadd.f32 %v667_v48, %v506_v50 }
 0x109   : > { %v765_v38 = vmax.f32 %v733_v33, 0.0 }
 0x10a   : > { %v369_v39 = vpop.permute.xlu1 %368  ;;  %v735_v2 = vadd.f32 %v1542_v43, %v699_v55 }
 0x10b   : > { %v783_v40 = vpack.c.bf16 %v765_v38, %v764_v37  ;;  %v487_v41 = vmul.f32 %v1531_v35, %v369_v39  ;;  %v635_v39 = vpop.permute.xlu0 %634 }
 0x10c   : > { %v767_v9 = vmax.f32 %v735_v2, 0.0 }
 0x10d   : > { %1303 = vmatmul.msk.bf16.gmra.mxu2 %vm818_vm1, %v783_v40  ;;  %v680_v45 = vadd.f32 %v648_v42, %v487_v41  ;;  %v669_v42 = vmul.f32 %v1533_v36, %v635_v39 }
 0x10e   : > { %v384_v59 = vpop.permute.xlu2 %383 }
 0x10f   : > { %v716_v51 = vadd.f32 %v1542_v43, %v680_v45  ;;  %v490_v17 = vmul.f32 %v1531_v35, %v384_v59 }
 0x111   : > { %v748_v56 = vmax.f32 %v716_v51, 0.0 }
 0x113   : > { %v555_v46 = vpop.permute.xlu1 %554 }
 0x114   : > { %v649_v49 = vmul.f32 %v1533_v36, %v555_v46 }
 0x116   : > { %v681_v52 = vadd.f32 %v649_v49, %v488_v47  ;;  %v469_v15 = vpop.permute.xlu2 %468 }
 0x117   : > { %v920_v53 = vpop.f32.mrf.mxu2  ;;  %v507_v28 = vmul.f32 %v1531_v35, %v469_v15 }
 0x118   : > { %v717_v54 = vadd.f32 %v1542_v43, %v681_v52  ;;  %v921_v4 = vadd.f32 %v1688_v58, %v920_v53 }
 0x11a   : > { %v749_v57 = vmax.f32 %v717_v54, 0.0  ;;  %v976_v11 = vmax.f32 %v921_v4, 0.0 }
 0x11b   : > { %v623_v61 = vpop.permute.xlu1 %622 }
 0x11c   : > { %v666_v62 = vmul.f32 %v1533_v36, %v623_v61  ;;  %v775_v3 = vpack.c.bf16 %v749_v57, %v748_v56  ;;  %v567_v56 = vpop.permute.xlu0 %566 }
 0x11e   : > { %v698_v5 = vadd.f32 %v666_v62, %v505_v60  ;;  %1295 = vmatmul.msk.bf16.gmra.mxu0 %vm818_vm1, %v775_v3 }
 0x11f   : > { %v922_v6 = vpop.f32.mrf.mxu2  ;;  %v631_v24 = vpop.permute.xlu2 %630 }
 0x120   : > { %v734_v7 = vadd.f32 %v1542_v43, %v698_v5  ;;  %v923_v10 = vadd.f32 %v1688_v58, %v922_v6  ;;  %v668_v30 = vmul.f32 %v1533_v36, %v631_v24  ;;  %v652_v5 = vmul.f32 %v1533_v36, %v567_v56 }
 0x122   : > { %v766_v12 = vmax.f32 %v734_v7, 0.0  ;;  %v977_v13 = vmax.f32 %v923_v10, 0.0  ;;  %v700_v37 = vadd.f32 %v668_v30, %v507_v28 }
 0x124   : > { %v1000_v14 = vpack.c.bf16 %v977_v13, %v976_v11  ;;  %v379_v16 = vpop.permute.xlu1 %378  ;;  %v784_v18 = vpack.c.bf16 %v767_v9, %v766_v12  ;;  %v736_v46 = vadd.f32 %v1542_v43, %v700_v37 }
 0x125   : > { %v489_v20 = vmul.f32 %v1531_v35, %v379_v16 }
 0x126   : > { %1304 = vmatmul.msk.bf16.gmra.mxu2 %vm818_vm1, %v784_v18  ;;  %1326 = vmatmul.msk.bf16.vlgmr.msra.gmra.mxu3 %vm818_vm1, %v1000_v14  ;;  %v768_v50 = vmax.f32 %v736_v46, 0.0 }
 0x127   : > { %v682_v22 = vadd.f32 %v650_v19, %v489_v20 }
 0x128   : > { %v394_v4 = vpop.permute.xlu2 %393 }
 0x129   : > { %v718_v26 = vadd.f32 %v1542_v43, %v682_v22  ;;  %v492_v11 = vmul.f32 %v1531_v35, %v394_v4 }
 0x12a   : > { %v880_v21 = vpop.f32.mrf.mxu0 }
 0x12b   : > { %v881_v29 = vadd.f32 %v1688_v58, %v880_v21  ;;  %v750_v1 = vmax.f32 %v718_v26, 0.0 }
 0x12d   : > { %v563_v23 = vpop.permute.xlu1 %562  ;;  %v960_v34 = vmax.f32 %v881_v29, 0.0 }
 0x12e   : > { %v651_v25 = vmul.f32 %v1533_v36, %v563_v23 }
 0x130   : > { %v683_v27 = vadd.f32 %v651_v25, %v490_v17 }
 0x132   : > { %v719_v8 = vadd.f32 %v1542_v43, %v683_v27  ;;  %v882_v31 = vpop.f32.mrf.mxu0 }
 0x133   : > { %v883_v32 = vadd.f32 %v1688_v58, %v882_v31 }
 0x134   : > { %v751_v33 = vmax.f32 %v719_v8, 0.0 }
 0x135   : > { %v961_v38 = vmax.f32 %v883_v32, 0.0 }
 0x136   : > { %v474_v40 = vpop.permute.xlu1 %473  ;;  %v776_v41 = vpack.c.bf16 %v751_v33, %v750_v1 }
 0x137   : > { %v992_v0 = vpack.c.bf16 %v961_v38, %v960_v34  ;;  %v508_v44 = vmul.f32 %v1531_v35, %v474_v40 }
 0x138   : > { %1296 = vmatmul.msk.bf16.gmra.mxu0 %vm818_vm1, %v776_v41  ;;  %v925_v45 = vpop.f32.mrf.mxu2 }
 0x139   : > { %v701_v47 = vadd.f32 %v669_v42, %v508_v44  ;;  %1318 = vmatmul.msk.bf16.vlgmr.msra.gmra.mxu1 %vm818_vm1, %v992_v0  ;;  %v926_v53 = vadd.f32 %v1688_v58, %v925_v45 }
 0x13a   : > { %v885_v48 = vpop.f32.mrf.mxu0 }
 0x13b   : > { %v737_v49 = vadd.f32 %v1542_v43, %v701_v47  ;;  %v886_v57 = vadd.f32 %v1688_v58, %v885_v48  ;;  %v978_v62 = vmax.f32 %v926_v53, 0.0 }
 0x13d   : > { %v769_v51 = vmax.f32 %v737_v49, 0.0  ;;  %v962_v6 = vmax.f32 %v886_v57, 0.0 }
 0x13e   : > { %v389_v52 = vpop.permute.xlu1 %388 }
 0x13f   : > { %v785_v54 = vpack.c.bf16 %v769_v51, %v768_v50  ;;  %v491_v61 = vmul.f32 %v1531_v35, %v389_v52 }
 0x140   : > { %v927_v55 = vpop.f32.mrf.mxu2 }
 0x141   : > { %v928_v59 = vadd.f32 %v1688_v58, %v927_v55  ;;  %1305 = vmatmul.msk.bf16.gmra.mxu2 %vm818_vm1, %v785_v54  ;;  %v684_v10 = vadd.f32 %v652_v5, %v491_v61 }
 0x142   : > { %v887_v60 = vpop.f32.mrf.mxu0 }
 0x143   : > { %v979_v2 = vmax.f32 %v928_v59, 0.0  ;;  %v888_v3 = vadd.f32 %v1688_v58, %v887_v60  ;;  %v720_v16 = vadd.f32 %v1542_v43, %v684_v10 }
 0x145   : > { %v1001_v7 = vpack.c.bf16 %v979_v2, %v978_v62  ;;  %v963_v9 = vmax.f32 %v888_v3, 0.0  ;;  %v752_v20 = vmax.f32 %v720_v16, 0.0 }
 0x147   : > { %v993_v12 = vpack.c.bf16 %v963_v9, %v962_v6  ;;  %v571_v13 = vpop.permute.xlu1 %570  ;;  %1327 = vmatmul.msk.bf16.gmra.mxu3 %vm818_vm1, %v1001_v7 }
 0x148   : > { %v653_v14 = vmul.f32 %v1533_v36, %v571_v13  ;;  %v930_v15 = vpop.f32.mrf.mxu2  ;;  %v1755_v13 = vld [vmem:[%s1882_s6] ss:$0 sm:$0xff] }
 0x149   : > { %1319 = vmatmul.msk.bf16.gmra.mxu1 %vm818_vm1, %v993_v12  ;;  %v931_v22 = vadd.f32 %v1688_v58, %v930_v15 }
 0x14a   : > { %v685_v18 = vadd.f32 %v653_v14, %v492_v11 }
 0x14b   : > { %v980_v36 = vmax.f32 %v931_v22, 0.0 }
 0x14c   : > { %v721_v63 = vadd.f32 %v1542_v43, %v685_v18 }
 0x14d   : > { %v890_v19 = vpop.f32.mrf.mxu0 }
 0x14e   : > { %v753_v21 = vmax.f32 %v721_v63, 0.0  ;;  %v891_v25 = vadd.f32 %v1688_v58, %v890_v19 }
 0x150   : > { %v932_v35 = vpop.f32.mrf.mxu2  ;;  %v777_v23 = vpack.c.bf16 %v753_v21, %v752_v20  ;;  %v964_v43 = vmax.f32 %v891_v25, 0.0 }
 0x151   : > { %v933_v17 = vadd.f32 %v1688_v58, %v932_v35 }
 0x152   : > { %1297 = vmatmul.msk.bf16.gmra.mxu0 %vm818_vm1, %v777_v23 }
 0x153   : > { %v981_v24 = vmax.f32 %v933_v17, 0.0 }
 0x155   : > { %v1002_v26 = vpack.c.bf16 %v981_v24, %v980_v36  ;;  %v892_v27 = vpop.f32.mrf.mxu0 }
 0x156   : > { %v893_v28 = vadd.f32 %v1688_v58, %v892_v27 }
 0x157   : > { %1328 = vmatmul.msk.bf16.gmra.mxu3 %vm818_vm1, %v1002_v26 }
 0x158   : > { %v965_v29 = vmax.f32 %v893_v28, 0.0 }
 0x15a   : > { %v994_v30 = vpack.c.bf16 %v965_v29, %v964_v43 }
 0x15c   : > { %v935_v8 = vpop.f32.mrf.mxu2  ;;  %1320 = vmatmul.msk.bf16.gmra.mxu1 %vm818_vm1, %v994_v30 }
 0x15d   : > { %v936_v31 = vadd.f32 %v1688_v58, %v935_v8 }
 0x15f   : > { %v982_v33 = vmax.f32 %v936_v31, 0.0 }
 0x164   : > { %v937_v32 = vpop.f32.mrf.mxu2 }
 0x165   : > { %v938_v1 = vadd.f32 %v1688_v58, %v937_v32 }
 0x167   : > { %v983_v34 = vmax.f32 %v938_v1, 0.0  ;;  %v895_v37 = vpop.f32.mrf.mxu0 }
 0x168   : > { %v896_v39 = vadd.f32 %v1688_v58, %v895_v37 }
 0x169   : > { %v1003_v38 = vpack.c.bf16 %v983_v34, %v982_v33 }
 0x16a   : > { %v966_v42 = vmax.f32 %v896_v39, 0.0 }
 0x16b   : > { %1329 = vmatmul.msk.bf16.gmra.mxu3 %vm818_vm1, %v1003_v38 }
 0x16f   : > { %v897_v40 = vpop.f32.mrf.mxu0 }
 0x170   : > { %v898_v41 = vadd.f32 %v1688_v58, %v897_v40 }
 0x172   : > { %v967_v0 = vmax.f32 %v898_v41, 0.0 }
 0x174   : > { %v995_v44 = vpack.c.bf16 %v967_v0, %v966_v42 }
 0x175   : > { %v940_v45 = vpop.f32.mrf.mxu2 }
 0x176   : > { %1321 = vmatmul.msk.bf16.gmra.mxu1 %vm818_vm1, %v995_v44  ;;  %v941_v46 = vadd.f32 %v1688_v58, %v940_v45 }
 0x178   : > { %v984_v49 = vmax.f32 %v941_v46, 0.0 }
 0x17d   : > { %v942_v47 = vpop.f32.mrf.mxu2 }
 0x17e   : > { %v943_v48 = vadd.f32 %v1688_v58, %v942_v47 }
 0x180   : > { %v985_v50 = vmax.f32 %v943_v48, 0.0 }
 0x181   : > { %v900_v51 = vpop.f32.mrf.mxu0 }
 0x182   : > { %v1004_v52 = vpack.c.bf16 %v985_v50, %v984_v49  ;;  %v901_v53 = vadd.f32 %v1688_v58, %v900_v51 }
 0x184   : > { %1330 = vmatmul.msk.bf16.gmra.mxu3 %vm818_vm1, %v1004_v52  ;;  %v968_v56 = vmax.f32 %v901_v53, 0.0 }
 0x189   : > { %v902_v54 = vpop.f32.mrf.mxu0 }
 0x18a   : > { %v903_v55 = vadd.f32 %v1688_v58, %v902_v54 }
 0x18c   : > { %v969_v57 = vmax.f32 %v903_v55, 0.0 }
 0x18e   : > { %v996_v59 = vpack.c.bf16 %v969_v57, %v968_v56 }
 0x190   : > { %v945_v61 = vpop.f32.mrf.mxu2  ;;  %1322 = vmatmul.msk.bf16.gmra.mxu1 %vm818_vm1, %v996_v59 }
 0x191   : > { %v946_v60 = vadd.f32 %v1688_v58, %v945_v61 }
 0x193   : > { %v986_v3 = vmax.f32 %v946_v60, 0.0 }
 0x198   : > { %v947_v62 = vpop.f32.mrf.mxu2 }
 0x199   : > { %v948_v2 = vadd.f32 %v1688_v58, %v947_v62 }
 0x19b   : > { %v987_v4 = vmax.f32 %v948_v2, 0.0  ;;  %v905_v5 = vpop.f32.mrf.mxu0 }
 0x19c   : > { %v906_v7 = vadd.f32 %v1688_v58, %v905_v5 }
 0x19d   : > { %v1005_v6 = vpack.c.bf16 %v987_v4, %v986_v3 }
 0x19e   : > { %v970_v11 = vmax.f32 %v906_v7, 0.0 }
 0x19f   : > { %1331 = vmatmul.msk.bf16.gmra.mxu3 %vm818_vm1, %v1005_v6 }
 0x1a3   : > { %v907_v9 = vpop.f32.mrf.mxu0 }
 0x1a4   : > { %v908_v10 = vadd.f32 %v1688_v58, %v907_v9 }
 0x1a6   : > { %v971_v12 = vmax.f32 %v908_v10, 0.0 }
 0x1a8   : > { %v997_v14 = vpack.c.bf16 %v971_v12, %v970_v11 }
 0x1a9   : > { %v950_v15 = vpop.f32.mrf.mxu2  ;;  %v1140_v16 = vpop.f32.mrf.mxu3 }
 0x1aa   : > { %v1141_v18 = vadd.f32 %v1755_v13, %v1140_v16  ;;  %1323 = vmatmul.msk.bf16.gmra.mxu1 %vm818_vm1, %v997_v14  ;;  %v951_v63 = vadd.f32 %v1688_v58, %v950_v15 }
 0x1ac   : > { %1197 = vst.msk [vmem:[%s1762_s14 + $0x80] sm:$0xff] %vm1180_vm2, %v1141_v18  ;;  %v988_v35 = vmax.f32 %v951_v63, 0.0 }
 0x1b1   : > { %v952_v19 = vpop.f32.mrf.mxu2  ;;  %v1142_v20 = vpop.f32.mrf.mxu3 }
 0x1b2   : > { %v953_v21 = vadd.f32 %v1688_v58, %v952_v19  ;;  %v1143_v22 = vadd.f32 %v1755_v13, %v1142_v20 }
 0x1b4   : > { %v989_v23 = vmax.f32 %v953_v21, 0.0  ;;  %1198 = vst.msk [vmem:[%s1762_s14 + $0x88] sm:$0xff] %vm1180_vm2, %v1143_v22 }
 0x1b5   : > { %v910_v17 = vpop.f32.mrf.mxu0 }
 0x1b6   : > { %v1006_v36 = vpack.c.bf16 %v989_v23, %v988_v35  ;;  %v1100_v24 = vpop.f32.mrf.mxu1  ;;  %v911_v26 = vadd.f32 %v1688_v58, %v910_v17 }
 0x1b7   : > { %v1101_v25 = vadd.f32 %v1755_v13, %v1100_v24 }
 0x1b8   : > { %1332 = vmatmul.msk.bf16.gmra.mxu3 %vm818_vm1, %v1006_v36  ;;  %v972_v30 = vmax.f32 %v911_v26, 0.0 }
 0x1b9   : > { %1181 = vst.msk [vmem:[%s1762_s14] sm:$0xff] %vm1180_vm2, %v1101_v25 }
 0x1bd   : > { %v912_v27 = vpop.f32.mrf.mxu0 }
 0x1be   : > { %v913_v28 = vadd.f32 %v1688_v58, %v912_v27  ;;  %v1102_v43 = vpop.f32.mrf.mxu1 }
 0x1bf   : > { %v1103_v29 = vadd.f32 %v1755_v13, %v1102_v43 }
 0x1c0   : > { %v973_v8 = vmax.f32 %v913_v28, 0.0 }
 0x1c1   : > { %1182 = vst.msk [vmem:[%s1762_s14 + $0x8] sm:$0xff] %vm1180_vm2, %v1103_v29 }
 0x1c2   : > { %v998_v31 = vpack.c.bf16 %v973_v8, %v972_v30 }
 0x1c4   : > { %v955_v32 = vpop.f32.mrf.mxu2  ;;  %1324 = vmatmul.msk.bf16.gmra.mxu1 %vm818_vm1, %v998_v31 }
 0x1c5   : > { %v956_v37 = vadd.f32 %v1688_v58, %v955_v32 }
 0x1c6   : > { %v1105_v1 = vpop.f32.mrf.mxu1 }
 0x1c7   : > { %v1106_v33 = vadd.f32 %v1755_v13, %v1105_v1  ;;  %v990_v42 = vmax.f32 %v956_v37, 0.0 }
 0x1c9   : > { %1183 = vst.msk [vmem:[%s1762_s14 + $0x10] sm:$0xff] %vm1180_vm2, %v1106_v33 }
 0x1ca   : > { %v1145_v34 = vpop.f32.mrf.mxu3 }
 0x1cb   : > { %v1146_v38 = vadd.f32 %v1755_v13, %v1145_v34 }
 0x1cc   : > { %v957_v39 = vpop.f32.mrf.mxu2 }
 0x1cd   : > { %1199 = vst.msk [vmem:[%s1762_s14 + $0x90] sm:$0xff] %vm1180_vm2, %v1146_v38  ;;  %v958_v40 = vadd.f32 %v1688_v58, %v957_v39 }
 0x1ce   : > { %v1107_v41 = vpop.f32.mrf.mxu1 }
 0x1cf   : > { %v991_v0 = vmax.f32 %v958_v40, 0.0  ;;  %v1108_v44 = vadd.f32 %v1755_v13, %v1107_v41  ;;  %v915_v45 = vpop.f32.mrf.mxu0 }
 0x1d0   : > { %v916_v49 = vadd.f32 %v1688_v58, %v915_v45 }
 0x1d1   : > { %v1007_v46 = vpack.c.bf16 %v991_v0, %v990_v42  ;;  %1184 = vst.msk [vmem:[%s1762_s14 + $0x18] sm:$0xff] %vm1180_vm2, %v1108_v44 }
 0x1d2   : > { %v1147_v47 = vpop.f32.mrf.mxu3  ;;  %v974_v53 = vmax.f32 %v916_v49, 0.0 }
 0x1d3   : > { %v1148_v48 = vadd.f32 %v1755_v13, %v1147_v47  ;;  %1333 = vmatmul.msk.bf16.gmra.mxu3 %vm818_vm1, %v1007_v46 }
 0x1d5   : > { %1200 = vst.msk [vmem:[%s1762_s14 + $0x98] sm:$0xff] %vm1180_vm2, %v1148_v48 }
 0x1d7   : > { %v917_v50 = vpop.f32.mrf.mxu0 }
 0x1d8   : > { %v918_v51 = vadd.f32 %v1688_v58, %v917_v50 }
 0x1d9   : > { %v1110_v52 = vpop.f32.mrf.mxu1 }
 0x1da   : > { %v975_v54 = vmax.f32 %v918_v51, 0.0  ;;  %v1111_v55 = vadd.f32 %v1755_v13, %v1110_v52  ;;  %v1150_v56 = vpop.f32.mrf.mxu3 }
 0x1db   : > { %v1151_v57 = vadd.f32 %v1755_v13, %v1150_v56 }
 0x1dc   : > { %v999_v59 = vpack.c.bf16 %v975_v54, %v974_v53  ;;  %1185 = vst.msk [vmem:[%s1762_s14 + $0x20] sm:$0xff] %vm1180_vm2, %v1111_v55 }
 0x1dd   : > { %1201 = vst.msk [vmem:[%s1762_s14 + $0xa0] sm:$0xff] %vm1180_vm2, %v1151_v57 }
 0x1de   : > { %1325 = vmatmul.msk.bf16.gmra.mxu1 %vm818_vm1, %v999_v59 }
 0x1e1   : > { %v1112_v58 = vpop.f32.mrf.mxu1 }
 0x1e2   : > { %v1113_v61 = vadd.f32 %v1755_v13, %v1112_v58  ;;  %v1152_v60 = vpop.f32.mrf.mxu3 }
 0x1e3   : > { %v1153_v62 = vadd.f32 %v1755_v13, %v1152_v60 }
 0x1e4   : > { %1186 = vst.msk [vmem:[%s1762_s14 + $0x28] sm:$0xff] %vm1180_vm2, %v1113_v61 }
 0x1e5   : > { %1202 = vst.msk [vmem:[%s1762_s14 + $0xa8] sm:$0xff] %vm1180_vm2, %v1153_v62 }
 0x1ee   : > { %v1155_v2 = vpop.f32.mrf.mxu3 }
 0x1ef   : > { %v1156_v3 = vadd.f32 %v1755_v13, %v1155_v2 }
 0x1f1   : > { %1203 = vst.msk [vmem:[%s1762_s14 + $0xb0] sm:$0xff] %vm1180_vm2, %v1156_v3 }
 0x1f3   : > { %v1115_v4 = vpop.f32.mrf.mxu1 }
 0x1f4   : > { %v1116_v5 = vadd.f32 %v1755_v13, %v1115_v4 }
 0x1f6   : > { %1187 = vst.msk [vmem:[%s1762_s14 + $0x30] sm:$0xff] %vm1180_vm2, %v1116_v5  ;;  %v1157_v6 = vpop.f32.mrf.mxu3 }
 0x1f7   : > { %v1158_v7 = vadd.f32 %v1755_v13, %v1157_v6 }
 0x1f9   : > { %1204 = vst.msk [vmem:[%s1762_s14 + $0xb8] sm:$0xff] %vm1180_vm2, %v1158_v7 }
 0x1fb   : > { %v1117_v9 = vpop.f32.mrf.mxu1 }
 0x1fc   : > { %v1118_v10 = vadd.f32 %v1755_v13, %v1117_v9 }
 0x1fe   : > { %1188 = vst.msk [vmem:[%s1762_s14 + $0x38] sm:$0xff] %vm1180_vm2, %v1118_v10 }
 0x207   : > { %v1160_v11 = vpop.f32.mrf.mxu3 }
 0x208   : > { %v1161_v12 = vadd.f32 %v1755_v13, %v1160_v11 }
 0x20a   : > { %1205 = vst.msk [vmem:[%s1762_s14 + $0xc0] sm:$0xff] %vm1180_vm2, %v1161_v12 }
 0x20d   : > { %v1120_v14 = vpop.f32.mrf.mxu1 }
 0x20e   : > { %v1121_v15 = vadd.f32 %v1755_v13, %v1120_v14 }
 0x20f   : > { %v1162_v16 = vpop.f32.mrf.mxu3 }
 0x210   : > { %1189 = vst.msk [vmem:[%s1762_s14 + $0x40] sm:$0xff] %vm1180_vm2, %v1121_v15  ;;  %v1163_v18 = vadd.f32 %v1755_v13, %v1162_v16 }
 0x212   : > { %1206 = vst.msk [vmem:[%s1762_s14 + $0xc8] sm:$0xff] %vm1180_vm2, %v1163_v18 }
 0x215   : > { %v1122_v63 = vpop.f32.mrf.mxu1 }
 0x216   : > { %v1123_v19 = vadd.f32 %v1755_v13, %v1122_v63 }
 0x218   : > { %1190 = vst.msk [vmem:[%s1762_s14 + $0x48] sm:$0xff] %vm1180_vm2, %v1123_v19 }
 0x222   : > { %v1165_v20 = vpop.f32.mrf.mxu3 }
 0x223   : > { %v1166_v21 = vadd.f32 %v1755_v13, %v1165_v20 }
 0x225   : > { %1207 = vst.msk [vmem:[%s1762_s14 + $0xd0] sm:$0xff] %vm1180_vm2, %v1166_v21 }
 0x227   : > { %v1125_v22 = vpop.f32.mrf.mxu1 }
 0x228   : > { %v1126_v35 = vadd.f32 %v1755_v13, %v1125_v22 }
 0x22a   : > { %1191 = vst.msk [vmem:[%s1762_s14 + $0x50] sm:$0xff] %vm1180_vm2, %v1126_v35  ;;  %v1167_v23 = vpop.f32.mrf.mxu3 }
 0x22b   : > { %v1168_v17 = vadd.f32 %v1755_v13, %v1167_v23 }
 0x22d   : > { %1208 = vst.msk [vmem:[%s1762_s14 + $0xd8] sm:$0xff] %vm1180_vm2, %v1168_v17 }
 0x22f   : > { %v1127_v36 = vpop.f32.mrf.mxu1 }
 0x230   : > { %v1128_v24 = vadd.f32 %v1755_v13, %v1127_v36 }
 0x232   : > { %1192 = vst.msk [vmem:[%s1762_s14 + $0x58] sm:$0xff] %vm1180_vm2, %v1128_v24 }
 0x23b   : > { %v1170_v25 = vpop.f32.mrf.mxu3 }
 0x23c   : > { %v1171_v26 = vadd.f32 %v1755_v13, %v1170_v25 }
 0x23e   : > { %1209 = vst.msk [vmem:[%s1762_s14 + $0xe0] sm:$0xff] %vm1180_vm2, %v1171_v26 }
 0x241   : > { %v1130_v27 = vpop.f32.mrf.mxu1 }
 0x242   : > { %v1131_v28 = vadd.f32 %v1755_v13, %v1130_v27 }
 0x243   : > { %v1172_v43 = vpop.f32.mrf.mxu3 }
 0x244   : > { %1193 = vst.msk [vmem:[%s1762_s14 + $0x60] sm:$0xff] %vm1180_vm2, %v1131_v28  ;;  %v1173_v29 = vadd.f32 %v1755_v13, %v1172_v43 }
 0x246   : > { %1210 = vst.msk [vmem:[%s1762_s14 + $0xe8] sm:$0xff] %vm1180_vm2, %v1173_v29 }
 0x249   : > { %v1132_v30 = vpop.f32.mrf.mxu1 }
 0x24a   : > { %v1133_v8 = vadd.f32 %v1755_v13, %v1132_v30 }
 0x24c   : > { %1194 = vst.msk [vmem:[%s1762_s14 + $0x68] sm:$0xff] %vm1180_vm2, %v1133_v8 }
 0x256   : > { %v1175_v31 = vpop.f32.mrf.mxu3 }
 0x257   : > { %v1176_v32 = vadd.f32 %v1755_v13, %v1175_v31 }
 0x259   : > { %1211 = vst.msk [vmem:[%s1762_s14 + $0xf0] sm:$0xff] %vm1180_vm2, %v1176_v32 }
 0x25b   : > { %v1135_v1 = vpop.f32.mrf.mxu1 }
 0x25c   : > { %v1136_v33 = vadd.f32 %v1755_v13, %v1135_v1 }
 0x25e   : > { %1195 = vst.msk [vmem:[%s1762_s14 + $0x70] sm:$0xff] %vm1180_vm2, %v1136_v33  ;;  %v1177_v34 = vpop.f32.mrf.mxu3 }
 0x25f   : > { %v1178_v37 = vadd.f32 %v1755_v13, %v1177_v34 }
 0x261   : > { %1212 = vst.msk [vmem:[%s1762_s14 + $0xf8] sm:$0xff] %vm1180_vm2, %v1178_v37 }
 0x263   : > { %v1137_v38 = vpop.f32.mrf.mxu1 }
 0x264   : > { %v1138_v39 = vadd.f32 %v1755_v13, %v1137_v38 }
 0x266   : > { %1196 = vst.msk [vmem:[%s1762_s14 + $0x78] sm:$0xff] %vm1180_vm2, %v1138_v39 }
 0x267 PF: > { %s17_s24 = sadd.s32 1, %s1403_s24  }
 0x268   : > { %p14_p4 = scmp.ge.s32.totalorder %s17_s24, 4  }
 0x26a   :  { %16 = sbr.rel (!%p14_p4) target bundleno = 1 (0x1), region = 78 }

</bundles_post_ra>
